<compile_context>
chip_gen: v7x
topology: tpu7x:2x2x1
jax: 0.10.0
libtpu: 0.0.40
codegen_flags: <defaults>
</compile_context>

<pallas_src>
import functools

import jax
import jax.numpy as jnp
from jax.experimental import pallas as pl
from jax.experimental.pallas import tpu as pltpu


def _round_up(a, m):
    return (a + m - 1) // m * m


def _aligned_divisors_desc(total, align, cap):
    """Divisors d of `total` with d % align == 0 and d <= cap, descending."""
    m = total // align
    out = [k * align for k in range(m, 0, -1) if m % k == 0 and k * align <= cap]
    return out or [align]


def _vmem_capacity_bytes():
    try:
        info = pltpu.get_tpu_info()
        cap = getattr(info, "vmem_capacity_bytes", None)
        if cap:
            return int(cap)
    except Exception:
        pass
    return 64 << 20  # conservative fallback (v7x per-TensorCore VMEM)


# --------------------------------------------------------------------------
# Kernel
# --------------------------------------------------------------------------
def _mlp_kernel(x_ref, lw_ref, lb_ref, wg_ref, bg_ref, wd_ref, bd_ref,
                scale_ref, o_ref, ln_scratch, *scratch, eps, acc_in_out):
    # Accumulator: either the resident output block (f32 outputs) or an f32
    # VMEM scratch (sub-f32 outputs).
    acc_ref = o_ref if acc_in_out else scratch[0]
    j = pl.program_id(1)

    # First intermediate tile of this row tile: LayerNorm once (f32 math),
    # store in compute dtype, zero the accumulator.
    @pl.when(j == 0)
    def _():
        xf = x_ref[...].astype(jnp.float32)                     # [tr, H]
        mean = jnp.mean(xf, axis=-1, keepdims=True)
        xc = xf - mean
        var = jnp.mean(xc * xc, axis=-1, keepdims=True)
        normed = xc * jax.lax.rsqrt(var + eps)
        normed = normed * lw_ref[...] + lb_ref[...]             # f32 params
        ln_scratch[...] = normed.astype(ln_scratch.dtype)
        acc_ref[...] = jnp.zeros_like(acc_ref)

    # gate = relu(ln(x) @ Wg[:, j_tile] + bg[j_tile])           [tr, tile_i]
    gate = jnp.dot(ln_scratch[...], wg_ref[...],
                   preferred_element_type=jnp.float32)
    gate = jnp.maximum(gate + bg_ref[...], 0.0)

    # acc += gate @ Wd[j_tile, :]   (bf16 operands, f32 accumulation)
    acc_ref[...] += jnp.dot(gate.astype(wd_ref.dtype), wd_ref[...],
                            preferred_element_type=jnp.float32)

    # Last intermediate tile: bias, padding mask, residual, cast, store.
    @pl.when(j == pl.num_programs(1) - 1)
    def _():
        out = acc_ref[...].astype(jnp.float32) + bd_ref[...]
        out = out * scale_ref[...]                              # (1 - paddings)
        out = out + x_ref[...].astype(jnp.float32)              # residual
        o_ref[...] = out.astype(o_ref.dtype)


# --------------------------------------------------------------------------
# One-time parameter preparation (hoisted out of the per-call hot path).
# --------------------------------------------------------------------------
def prepare_mlp_params(ln_weight, ln_bias, gate_weight, gate_bias,
                       down_weight, down_bias, *, compute_dtype=jnp.bfloat16):
    """Transpose/pad/cast the PyTorch-layout weights once.

    gate_weight: [I, H], down_weight: [H, I] (nn.Linear layout).
    compute_dtype: dtype of the matmul operands (None keeps original dtype).
    """
    H = ln_weight.shape[0]
    I = gate_weight.shape[0]
    assert gate_weight.shape == (I, H)
    assert down_weight.shape == (H, I)

    wdt = compute_dtype if compute_dtype is not None else gate_weight.dtype
    i_p = _round_up(I, 128)

    wg = gate_weight.T.astype(wdt)                  # [H, I]
    wd = down_weight.T.astype(wdt)                  # [I, H]
    bg = gate_bias.reshape(1, I).astype(jnp.float32)
    if i_p != I:
        # Zero-padded intermediate columns contribute relu(0) = 0.
        wg = jnp.pad(wg, ((0, 0), (0, i_p - I)))
        bg = jnp.pad(bg, ((0, 0), (0, i_p - I)))
        wd = jnp.pad(wd, ((0, i_p - I), (0, 0)))

    return dict(
        wg=wg, wd=wd, bg=bg,
        bd=down_bias.reshape(1, H).astype(jnp.float32),
        lw=ln_weight.reshape(1, H).astype(jnp.float32),
        lb=ln_bias.reshape(1, H).astype(jnp.float32),
    )


# --------------------------------------------------------------------------
# Forward (hot path): takes prepared params.
# --------------------------------------------------------------------------
def transformer_mlp_prepared(x, params, paddings=None, *, eps=1e-6,
                             row_tile_cap=512):
    orig_shape = x.shape
    H = orig_shape[-1]
    wg, wd, bg, bd, lw, lb = (params[k] for k in ("wg", "wd", "bg", "bd",
                                                  "lw", "lb"))
    i_p = wg.shape[1]

    rows = 1
    for s in orig_shape[:-1]:
        rows *= s
    x2d = x.reshape(rows, H)

    if paddings is not None:
        scale = 1.0 - paddings.reshape(rows, 1).astype(jnp.float32)
    else:
        scale = jnp.ones((rows, 1), jnp.float32)

    x_item = jnp.dtype(x.dtype).itemsize
    w_item = jnp.dtype(wg.dtype).itemsize
    row_align = {1: 32, 2: 16}.get(x_item, 8)       # full-vreg sublane packing
    acc_in_out = (x.dtype == jnp.float32)            # accumulate directly in out

    # ---- Row tiling: avoid padding whenever rows is already aligned. ------
    rows_p = rows if rows % row_align == 0 else None
    if rows_p is not None:
        r_cands = _aligned_divisors_desc(rows_p, row_align, row_tile_cap)
        if r_cands[0] < min(128, rows_p):            # only tiny divisors -> pad
            rows_p = None
    if rows_p is None:
        tr0 = min(row_tile_cap, _round_up(rows, row_align))
        rows_p = _round_up(rows, tr0)
        r_cands = _aligned_divisors_desc(rows_p, row_align, row_tile_cap)

    i_cands = _aligned_divisors_desc(i_p, 128, i_p)  # first entry is i_p

    # ---- Capacity-driven tile selection. -----------------------------------
    capacity = _vmem_capacity_bytes()
    budget = int(capacity * 0.8)

    def est(tr, ti):
        streamed = ti < i_p
        wbuf = 2 if streamed else 1                  # double-buffer only if streamed
        return (2 * tr * H * x_item                  # x windows
                + 2 * tr * H * x_item                # out windows
                + wbuf * (H * ti + ti * H) * w_item  # weight windows
                + tr * H * w_item                    # layernorm scratch
                + (0 if acc_in_out else tr * H * 4)  # f32 acc scratch
                + 2 * tr * ti * 4                    # f32 gate temporaries
                + 4 * (2 * H + i_p) * 4)             # biases / LN params (tiny)

    tile_rows, tile_i = None, None
    # Pass 1: both weight matrices fully resident (DMA'd from HBM exactly once).
    for tr in r_cands:
        if est(tr, i_p) <= budget:
            tile_rows, tile_i = tr, i_p
            break
    # Pass 2: stream the intermediate dimension.
    if tile_rows is None:
        for tr in r_cands:
            for ti in i_cands:
                if ti == i_p:
                    continue
                if est(tr, ti) <= budget:
                    tile_rows, tile_i = tr, ti
                    break
            if tile_rows is not None:
                break
    if tile_rows is None:                            # last resort: smallest tiles
        tile_rows, tile_i = r_cands[-1], i_cands[-1]

    # Keep >= 2 row tiles so the "parallel" axis can shard across v7x's 2 TCs.
    if rows_p // tile_rows == 1 and rows_p >= 2 * row_align:
        smaller = _aligned_divisors_desc(rows_p, row_align, rows_p // 2)
        if smaller and smaller[0] < tile_rows:
            tile_rows = smaller[0]

    need = est(tile_rows, tile_i)
    vmem_limit = min(int(capacity * 0.9), max(2 * need, 48 << 20))
    vmem_limit = int(max(vmem_limit, need + (4 << 20)))

    if rows_p != rows:
        x2d = jnp.pad(x2d, ((0, rows_p - rows), (0, 0)))
        scale = jnp.pad(scale, ((0, rows_p - rows), (0, 0)))

    grid = (rows_p // tile_rows, i_p // tile_i)

    kernel = functools.partial(_mlp_kernel, eps=eps, acc_in_out=acc_in_out)
    scratch_shapes = [pltpu.VMEM((tile_rows, H), wg.dtype)]     # layernorm out
    if not acc_in_out:
        scratch_shapes.append(pltpu.VMEM((tile_rows, H), jnp.float32))

    out2d = pl.pallas_call(
        kernel,
        out_shape=jax.ShapeDtypeStruct((rows_p, H), x.dtype),
        grid_spec=pltpu.PrefetchScalarGridSpec(
            num_scalar_prefetch=0,
            grid=grid,
            in_specs=[
                pl.BlockSpec((tile_rows, H), lambda i, j: (i, 0)),   # x
                pl.BlockSpec((1, H), lambda i, j: (0, 0)),           # ln weight
                pl.BlockSpec((1, H), lambda i, j: (0, 0)),           # ln bias
                pl.BlockSpec((H, tile_i), lambda i, j: (0, j)),      # gate W^T
                pl.BlockSpec((1, tile_i), lambda i, j: (0, j)),      # gate bias
                pl.BlockSpec((tile_i, H), lambda i, j: (j, 0)),      # down W^T
                pl.BlockSpec((1, H), lambda i, j: (0, 0)),           # down bias
                pl.BlockSpec((tile_rows, 1), lambda i, j: (i, 0)),   # 1 - paddings
            ],
            out_specs=pl.BlockSpec((tile_rows, H), lambda i, j: (i, 0)),
            scratch_shapes=scratch_shapes,
        ),
        compiler_params=pltpu.CompilerParams(
            dimension_semantics=("parallel", "arbitrary"),
            vmem_limit_bytes=vmem_limit,
        ),
    )(x2d, lw, lb, wg, bg, wd, bd, scale)

    if rows_p != rows:
        out2d = out2d[:rows]
    return out2d.reshape(orig_shape)


def transformer_mlp(x, ln_weight, ln_bias, gate_weight, gate_bias,
                    down_weight, down_bias, paddings=None, *,
                    eps=1e-6, compute_dtype=jnp.bfloat16):
    """Convenience wrapper (PyTorch nn.Linear weight layout).

    For repeated forwards, call `prepare_mlp_params` once and reuse the
    result with `transformer_mlp_prepared` so the transpose/pad/cast is not
    re-done every call.
    """
    params = prepare_mlp_params(ln_weight, ln_bias, gate_weight, gate_bias,
                                down_weight, down_bias,
                                compute_dtype=compute_dtype)
    return transformer_mlp_prepared(x, params, paddings, eps=eps)


# --------------------------------------------------------------------------
# Pure-JAX reference & self-test
# --------------------------------------------------------------------------
def _mlp_ref(x, ln_w, ln_b, gate_w, gate_b, down_w, down_b, paddings=None,
             eps=1e-6):
    xf = x.astype(jnp.float32)
    mean = xf.mean(-1, keepdims=True)
    xc = xf - mean
    var = (xc * xc).mean(-1, keepdims=True)
    normed = xc * jax.lax.rsqrt(var + eps) * ln_w + ln_b
    gate = jnp.maximum(normed @ gate_w.T + gate_b, 0.0)
    out = gate @ down_w.T + down_b
    if paddings is not None:
        out = out * (1.0 - paddings[..., None])
    return (out + xf).astype(x.dtype)


if __name__ == "__main__":
    # Small shapes implied by the forward: (batch, seq, hidden), PyTorch
    # default dtype float32.
    B, S, H, I = 2, 8, 32, 128
    key = jax.random.PRNGKey(0)
    ks = jax.random.split(key, 8)

    x = jax.random.normal(ks[0], (B, S, H), dtype=jnp.float32)
    ln_w = 1.0 + 0.1 * jax.random.normal(ks[1], (H,), dtype=jnp.float32)
    ln_b = 0.1 * jax.random.normal(ks[2], (H,), dtype=jnp.float32)
    gate_w = jax.random.normal(ks[3], (I, H), dtype=jnp.float32) * (1.0 / H ** 0.5)
    gate_b = 0.1 * jax.random.normal(ks[4], (I,), dtype=jnp.float32)
    down_w = jax.random.normal(ks[5], (H, I), dtype=jnp.float32) * (1.0 / I ** 0.5)
    down_b = 0.1 * jax.random.normal(ks[6], (H,), dtype=jnp.float32)
    paddings = (jax.random.uniform(ks[7], (B, S)) < 0.25).astype(jnp.float32)

    ref = _mlp_ref(x, ln_w, ln_b, gate_w, gate_b, down_w, down_b, paddings,
                   eps=1e-6)

    # f32-weight path (exact semantics).
    params_f32 = prepare_mlp_params(ln_w, ln_b, gate_w, gate_b, down_w, down_b,
                                    compute_dtype=None)
    out_f32 = transformer_mlp_prepared(x, params_f32, paddings, eps=1e-6)
    out_f32 = jax.block_until_ready(out_f32)
    assert out_f32.shape == x.shape and out_f32.dtype == x.dtype
    assert jnp.allclose(out_f32.astype(jnp.float32), ref.astype(jnp.float32),
                        atol=1e-2, rtol=1e-2)

    # bf16-compute path (default, MXU-friendly): prepare once, reuse.
    params_bf16 = prepare_mlp_params(ln_w, ln_b, gate_w, gate_b, down_w,
                                     down_b, compute_dtype=jnp.bfloat16)
    out_bf16 = transformer_mlp_prepared(x, params_bf16, paddings, eps=1e-6)
    out_bf16 = jax.block_until_ready(out_bf16)
    assert out_bf16.shape == x.shape and out_bf16.dtype == x.dtype
    assert jnp.allclose(out_bf16.astype(jnp.float32), ref.astype(jnp.float32),
                        atol=3e-2, rtol=3e-2)

    print("KERNEL_OK")
</pallas_src>

<mosaic_0001>
module attributes {stable_mosaic.version = 11 : i64} {
  func.func @_mlp_kernel(%arg0: i32, %arg1: i32, %arg2: memref<8x32xf32, #tpu.memory_space<vmem>>, %arg3: memref<1x32xf32, #tpu.memory_space<vmem>>, %arg4: memref<1x32xf32, #tpu.memory_space<vmem>>, %arg5: memref<32x128xf32, #tpu.memory_space<vmem>>, %arg6: memref<1x128xf32, #tpu.memory_space<vmem>>, %arg7: memref<128x32xf32, #tpu.memory_space<vmem>>, %arg8: memref<1x32xf32, #tpu.memory_space<vmem>>, %arg9: memref<8x1xf32, #tpu.memory_space<vmem>>, %arg10: memref<8x32xf32, #tpu.memory_space<vmem>>, %arg11: memref<8x32xf32, #tpu.memory_space<vmem>>) attributes {dimension_semantics = [#tpu.dimension_semantics<parallel>, #tpu.dimension_semantics<arbitrary>], iteration_bounds = array<i64: 2, 1>, scalar_prefetch = 0 : i64, scratch_operands = 1 : i64, tpu.core_type = #tpu.core_type<tc>, window_params = [{transform_indices = @transform_0, window_bounds = array<i64: 8, 32>}, {pipeline_mode = #tpu.pipeline_mode<synchronous>, transform_indices = @transform_1, window_bounds = array<i64: 1, 32>}, {pipeline_mode = #tpu.pipeline_mode<synchronous>, transform_indices = @transform_2, window_bounds = array<i64: 1, 32>}, {transform_indices = @transform_3, window_bounds = array<i64: 32, 128>}, {transform_indices = @transform_4, window_bounds = array<i64: 1, 128>}, {transform_indices = @transform_5, window_bounds = array<i64: 128, 32>}, {pipeline_mode = #tpu.pipeline_mode<synchronous>, transform_indices = @transform_6, window_bounds = array<i64: 1, 32>}, {transform_indices = @transform_7, window_bounds = array<i64: 8, 1>}, {transform_indices = @transform_8, window_bounds = array<i64: 8, 32>}]} {
    %c0_i32 = arith.constant 0 : i32
    %0 = arith.cmpi eq, %arg1, %c0_i32 : i32
    %1 = arith.extui %0 : i1 to i32
    %c0_i32_0 = arith.constant 0 : i32
    %2 = arith.cmpi ne, %1, %c0_i32_0 : i32
    scf.if %2 {
      %c0_16 = arith.constant 0 : index
      %c0_17 = arith.constant 0 : index
      %19 = vector.load %arg2[%c0_16, %c0_17] : memref<8x32xf32, #tpu.memory_space<vmem>>, vector<8x32xf32>
      %cst_18 = arith.constant dense<0.000000e+00> : vector<8xf32>
      %20 = vector.multi_reduction <add>, %19, %cst_18 [1] : vector<8x32xf32> to vector<8xf32>
      %21 = vector.shape_cast %20 : vector<8xf32> to vector<8x1xf32>
      %cst_19 = arith.constant 3.200000e+01 : f32
      %22 = vector.broadcast %cst_19 : f32 to vector<8x1xf32>
      %23 = arith.divf %21, %22 : vector<8x1xf32>
      %24 = vector.broadcast %23 : vector<8x1xf32> to vector<8x32xf32>
      %25 = arith.subf %19, %24 : vector<8x32xf32>
      %26 = arith.mulf %25, %25 : vector<8x32xf32>
      %cst_20 = arith.constant dense<0.000000e+00> : vector<8xf32>
      %27 = vector.multi_reduction <add>, %26, %cst_20 [1] : vector<8x32xf32> to vector<8xf32>
      %28 = vector.shape_cast %27 : vector<8xf32> to vector<8x1xf32>
      %cst_21 = arith.constant 3.200000e+01 : f32
      %29 = vector.broadcast %cst_21 : f32 to vector<8x1xf32>
      %30 = arith.divf %28, %29 : vector<8x1xf32>
      %cst_22 = arith.constant 9.99999997E-7 : f32
      %31 = vector.broadcast %cst_22 : f32 to vector<8x1xf32>
      %32 = arith.addf %30, %31 : vector<8x1xf32>
      %33 = math.rsqrt %32 : vector<8x1xf32>
      %34 = vector.broadcast %33 : vector<8x1xf32> to vector<8x32xf32>
      %35 = arith.mulf %25, %34 : vector<8x32xf32>
      %c0_23 = arith.constant 0 : index
      %c0_24 = arith.constant 0 : index
      %36 = vector.load %arg3[%c0_23, %c0_24] : memref<1x32xf32, #tpu.memory_space<vmem>>, vector<1x32xf32>
      %37 = vector.broadcast %36 : vector<1x32xf32> to vector<8x32xf32>
      %38 = arith.mulf %35, %37 : vector<8x32xf32>
      %c0_25 = arith.constant 0 : index
      %c0_26 = arith.constant 0 : index
      %39 = vector.load %arg4[%c0_25, %c0_26] : memref<1x32xf32, #tpu.memory_space<vmem>>, vector<1x32xf32>
      %40 = vector.broadcast %39 : vector<1x32xf32> to vector<8x32xf32>
      %41 = arith.addf %38, %40 : vector<8x32xf32>
      %c0_27 = arith.constant 0 : index
      %c0_28 = arith.constant 0 : index
      %42 = vector.load %arg11[%c0_27, %c0_28] : memref<8x32xf32, #tpu.memory_space<vmem>>, vector<8x32xf32>
      tpu.vector_store %arg11[%c0_27, %c0_28], %41 {strides = array<i32>} : memref<8x32xf32, #tpu.memory_space<vmem>>, vector<8x32xf32>,
      %cst_29 = arith.constant 0.000000e+00 : f32
      %43 = vector.broadcast %cst_29 : f32 to vector<8x32xf32>
      %c0_30 = arith.constant 0 : index
      %c0_31 = arith.constant 0 : index
      %44 = vector.load %arg10[%c0_30, %c0_31] : memref<8x32xf32, #tpu.memory_space<vmem>>, vector<8x32xf32>
      tpu.vector_store %arg10[%c0_30, %c0_31], %43 {strides = array<i32>} : memref<8x32xf32, #tpu.memory_space<vmem>>, vector<8x32xf32>,
    } else {
    }
    %c0 = arith.constant 0 : index
    %c0_1 = arith.constant 0 : index
    %3 = vector.load %arg11[%c0, %c0_1] : memref<8x32xf32, #tpu.memory_space<vmem>>, vector<8x32xf32>
    %c0_2 = arith.constant 0 : index
    %c0_3 = arith.constant 0 : index
    %4 = vector.load %arg5[%c0_2, %c0_3] : memref<32x128xf32, #tpu.memory_space<vmem>>, vector<32x128xf32>
    %cst = arith.constant dense<0.000000e+00> : vector<8x128xf32>
    %5 = tpu.matmul %3, %4, %cst {dimension_numbers = #tpu.dot_dimension_numbers<[1], [0], [0], [1], [0, 0, 1, 1], [], []>} : vector<8x32xf32>, vector<32x128xf32>, vector<8x128xf32> -> vector<8x128xf32>
    %c0_4 = arith.constant 0 : index
    %c0_5 = arith.constant 0 : index
    %6 = vector.load %arg6[%c0_4, %c0_5] : memref<1x128xf32, #tpu.memory_space<vmem>>, vector<1x128xf32>
    %7 = vector.broadcast %6 : vector<1x128xf32> to vector<8x128xf32>
    %8 = arith.addf %5, %7 : vector<8x128xf32>
    %cst_6 = arith.constant 0.000000e+00 : f32
    %9 = vector.broadcast %cst_6 : f32 to vector<8x128xf32>
    %10 = arith.maximumf %8, %9 : vector<8x128xf32>
    %c0_7 = arith.constant 0 : index
    %c0_8 = arith.constant 0 : index
    %11 = vector.load %arg10[%c0_7, %c0_8] : memref<8x32xf32, #tpu.memory_space<vmem>>, vector<8x32xf32>
    %c0_9 = arith.constant 0 : index
    %c0_10 = arith.constant 0 : index
    %12 = vector.load %arg7[%c0_9, %c0_10] : memref<128x32xf32, #tpu.memory_space<vmem>>, vector<128x32xf32>
    %cst_11 = arith.constant dense<0.000000e+00> : vector<8x32xf32>
    %13 = tpu.matmul %10, %12, %cst_11 {dimension_numbers = #tpu.dot_dimension_numbers<[1], [0], [0], [1], [0, 0, 1, 1], [], []>} : vector<8x128xf32>, vector<128x32xf32>, vector<8x32xf32> -> vector<8x32xf32>
    %14 = arith.addf %11, %13 : vector<8x32xf32>
    %c0_12 = arith.constant 0 : index
    %c0_13 = arith.constant 0 : index
    %15 = vector.load %arg10[%c0_12, %c0_13] : memref<8x32xf32, #tpu.memory_space<vmem>>, vector<8x32xf32>
    tpu.vector_store %arg10[%c0_12, %c0_13], %14 {strides = array<i32>} : memref<8x32xf32, #tpu.memory_space<vmem>>, vector<8x32xf32>,
    %c0_i32_14 = arith.constant 0 : i32
    %16 = arith.cmpi eq, %arg1, %c0_i32_14 : i32
    %17 = arith.extui %16 : i1 to i32
    %c0_i32_15 = arith.constant 0 : i32
    %18 = arith.cmpi ne, %17, %c0_i32_15 : i32
    scf.if %18 {
      %c0_16 = arith.constant 0 : index
      %c0_17 = arith.constant 0 : index
      %19 = vector.load %arg10[%c0_16, %c0_17] : memref<8x32xf32, #tpu.memory_space<vmem>>, vector<8x32xf32>
      %c0_18 = arith.constant 0 : index
      %c0_19 = arith.constant 0 : index
      %20 = vector.load %arg8[%c0_18, %c0_19] : memref<1x32xf32, #tpu.memory_space<vmem>>, vector<1x32xf32>
      %21 = vector.broadcast %20 : vector<1x32xf32> to vector<8x32xf32>
      %22 = arith.addf %19, %21 : vector<8x32xf32>
      %c0_20 = arith.constant 0 : index
      %c0_21 = arith.constant 0 : index
      %23 = vector.load %arg9[%c0_20, %c0_21] : memref<8x1xf32, #tpu.memory_space<vmem>>, vector<8x1xf32>
      %24 = vector.broadcast %23 : vector<8x1xf32> to vector<8x32xf32>
      %25 = arith.mulf %22, %24 : vector<8x32xf32>
      %c0_22 = arith.constant 0 : index
      %c0_23 = arith.constant 0 : index
      %26 = vector.load %arg2[%c0_22, %c0_23] : memref<8x32xf32, #tpu.memory_space<vmem>>, vector<8x32xf32>
      %27 = arith.addf %25, %26 : vector<8x32xf32>
      %c0_24 = arith.constant 0 : index
      %c0_25 = arith.constant 0 : index
      %28 = vector.load %arg10[%c0_24, %c0_25] : memref<8x32xf32, #tpu.memory_space<vmem>>, vector<8x32xf32>
      tpu.vector_store %arg10[%c0_24, %c0_25], %27 {strides = array<i32>} : memref<8x32xf32, #tpu.memory_space<vmem>>, vector<8x32xf32>,
    } else {
    }
    return
  }
  func.func @transform_0(%arg0: i32, %arg1: i32) -> (i32, i32) {
    %c0_i32 = arith.constant 0 : i32
    %c0_i32_0 = arith.constant 0 : i32
    return %arg0, %c0_i32 : i32, i32
  }
  func.func @transform_1(%arg0: i32, %arg1: i32) -> (i32, i32) {
    %c0_i32 = arith.constant 0 : i32
    %c0_i32_0 = arith.constant 0 : i32
    %c0_i32_1 = arith.constant 0 : i32
    return %c0_i32, %c0_i32_0 : i32, i32
  }
  func.func @transform_2(%arg0: i32, %arg1: i32) -> (i32, i32) {
    %c0_i32 = arith.constant 0 : i32
    %c0_i32_0 = arith.constant 0 : i32
    %c0_i32_1 = arith.constant 0 : i32
    return %c0_i32, %c0_i32_0 : i32, i32
  }
  func.func @transform_3(%arg0: i32, %arg1: i32) -> (i32, i32) {
    %c0_i32 = arith.constant 0 : i32
    %c0_i32_0 = arith.constant 0 : i32
    return %c0_i32, %arg1 : i32, i32
  }
  func.func @transform_4(%arg0: i32, %arg1: i32) -> (i32, i32) {
    %c0_i32 = arith.constant 0 : i32
    %c0_i32_0 = arith.constant 0 : i32
    return %c0_i32, %arg1 : i32, i32
  }
  func.func @transform_5(%arg0: i32, %arg1: i32) -> (i32, i32) {
    %c0_i32 = arith.constant 0 : i32
    %c0_i32_0 = arith.constant 0 : i32
    return %arg1, %c0_i32 : i32, i32
  }
  func.func @transform_6(%arg0: i32, %arg1: i32) -> (i32, i32) {
    %c0_i32 = arith.constant 0 : i32
    %c0_i32_0 = arith.constant 0 : i32
    %c0_i32_1 = arith.constant 0 : i32
    return %c0_i32, %c0_i32_0 : i32, i32
  }
  func.func @transform_7(%arg0: i32, %arg1: i32) -> (i32, i32) {
    %c0_i32 = arith.constant 0 : i32
    %c0_i32_0 = arith.constant 0 : i32
    return %arg0, %c0_i32 : i32, i32
  }
  func.func @transform_8(%arg0: i32, %arg1: i32) -> (i32, i32) {
    %c0_i32 = arith.constant 0 : i32
    %c0_i32_0 = arith.constant 0 : i32
    return %arg0, %c0_i32 : i32, i32
  }
}

</mosaic_0001>

<bundles_post_ra>
// kernel: tpu_custom_call.1
= control target key start
LH: loop header
LB: loop body
LE: loop exit
PB: predicated region body
PF: predicated region fallthrough
CT: control target
= control target key end

     0   :  { %13 = vsyncpa [#allocation4], 0  ;;  %s1288_s0 = inlined_call_operand.vmem [shape: f32[16,32], index: 0, kind: input, shape index: {}]   ;;  %s1289_s1 = inlined_call_operand.vmem [shape: f32[1,32], index: 1, kind: input, shape index: {}]   ;;  %s1290_s2 = inlined_call_operand.vmem [shape: f32[1,32], index: 2, kind: input, shape index: {}]   ;;  %s1291_s3 = inlined_call_operand.vmem [shape: f32[32,128], index: 3, kind: input, shape index: {}]   ;;  %s1292_s4 = inlined_call_operand.vmem [shape: f32[1,128], index: 4, kind: input, shape index: {}]   ;;  %s1293_s5 = inlined_call_operand.vmem [shape: f32[128,32], index: 5, kind: input, shape index: {}]   ;;  %s1294_s6 = inlined_call_operand.vmem [shape: f32[1,32], index: 6, kind: input, shape index: {}]   ;;  %s1295_s7 = inlined_call_operand.vmem [shape: f32[16,1], index: 7, kind: input, shape index: {}]   ;;  %s1296_s8 = inlined_call_operand.hbm [shape: f32[16,32], index: 8, kind: output, shape index: {}]  }
   0x1   :  { %15 = vsyncpa [#allocation4 + $0x1], 0  ;;  %s1065_s27 = smov 0   ;;  %s1067_s28 = smov 0  }
   0x2   :  { %s1069_s29 = smov 0   ;;  %s1071_s30 = smov 0  }
   0x3   :  { %s1073_s9 = smov 0   ;;  %s1075_s10 = smov 0  }
   0x4 LB: > { %s754_s11 = sadd.s32 4294967295, %s1013_s10   ;;  %s755_s12 = sadd.s32 4294967294, %s1013_s10   ;;  %s1013_s10 = sphi %s1075_s10, %s21_s10   ;;  %s1009_s9 = sphi %s1073_s9, %s1307_s9   ;;  %s1005_s30 = sphi %s1071_s30, %s1306_s30   ;;  %s1001_s29 = sphi %s1069_s29, %s1305_s29   ;;  %s997_s28 = sphi %s1067_s28, %s1304_s28   ;;  %s993_s27 = sphi %s1065_s27, %s1303_s27  }
   0x5   : > { %s33_s13 = sadd.s32 1, %s1009_s9  ;;  %s233_s14 = sadd.s32 1, %s1001_s29 }
   0x6   : > { %p35_p0 = scmp.ge.s32.totalorder %s33_s13, 2  ;;  %p243_p1 = scmp.ne.s32.totalorder %s1001_s29, %s997_s28 }
   0x7   : > { %p244_p2 = scmp.eq.s32.totalorder %s754_s11, 1  ;;  %p249_p3 = scmp.ne.s32.totalorder %s997_s28, %s993_s27 }
   0x8   : > { %s1309_s13 = smov (%p35_p0, %s33_s13), 0  ;;  %p250_p5 = scmp.eq.s32.totalorder %s755_s12, 1 }
   0x9   : > { %p1105_p4 = por %p244_p2, %p243_p1  ;;  %s230_s16 = ssub.s32 %s1009_s9, %s1309_s13 }
   0xa   : > { %p761_p6 = scmp.ge.s32.totalorder %s1013_s10, 1  ;;  %p231_p7 = scmp.eq.s32.totalorder %s230_s16, 0 }
   0xb   : > { %p1112_p8 = por %p250_p5, %p249_p3  ;;  %p313_p9 = scmp.lt.s32.totalorder %s1013_s10, 3 }
   0xc   : > { %s1118_s18 = scalar_select %p231_p7, %s1001_s29, %s233_s14  }
   0xd   : > { %p314_p10 = pnand %p761_p6, %p313_p9 }
   0xe   : > { %p362_p11 = scmp.lt.s32.totalorder (!%p314_p10), %s1005_s30, 1  ;;  %vm388_vm0 = vcmask (!%p314_p10), 261120   ;;  %v422_v7 = vld [vmem:[%s1291_s3] sm:$0xff] (!%p314_p10)  ;;  %v423_v8 = vld [vmem:[%s1291_s3 + $0x8] sm:$0xff] (!%p314_p10)  ;;  %v1015_v10 = vmov (!%p314_p10), 0.0|0.0   ;;  %v424_v11 = vld [vmem:[%s1291_s3 + $0x10] sm:$0xff] (!%p314_p10) }
   0xf   : > { %317 = sbr.rel (%p314_p10) target bundleno = 806 (0x326), region = 52  ;;  %v843_v9 = vpack.c.bf16 (!%p314_p10), %v423_v8, %v422_v7  ;;  %842 = vmatprep.subr.bf16.mxu0 (!%p314_p10), %v1015_v10  ;;  %v425_v12 = vld [vmem:[%s1291_s3 + $0x18] sm:$0xff] (!%p314_p10)  ;;  %s1297_s22 = sand.u32 (!%p314_p10), 1, %s997_s28   ;;  %848 = vmatprep.subr.bf16.mxu1 (!%p314_p10), %v1015_v10  ;;  %vm1016_vm1 = vmmov (!%p314_p10), 0   ;;  %v1017_v14 = vmov (!%p314_p10), 0.0   ;;  %v509_v15 = vld [vmem:[%s1293_s5] sm:$0xff] (!%p314_p10) }
  0x10   : > { %v846_v13 = vpack.c.bf16 (!%p314_p10), %v425_v12, %v424_v11  ;;  %804 = vmatprep.mubr.msk.f32.mxu0 (!%p314_p10), %vm1016_vm1, %v1017_v14  ;;  %839 = vmatprep.mubr.msk.f32.mxu1 (!%p314_p10), %vm1016_vm1, %v1017_v14  ;;  %v510_v16 = vld [vmem:[%s1293_s5 + $0x8] sm:$0xff] (!%p314_p10)  ;;  %v511_v17 = vld [vmem:[%s1293_s5 + $0x10] sm:$0xff] (!%p314_p10)  ;;  %v512_v19 = vld [vmem:[%s1293_s5 + $0x18] sm:$0xff] (!%p314_p10)  ;;  %v1018_v49 = vmov (!%p314_p10), 0   ;;  %s771_s12 = sshll.u32 (!%p314_p10), %s1005_s30, 7  ;;  %s1302_s21 = sand.u32 (!%p314_p10), 1, %s997_s28  }
  0x11   : > { %844 = vmatpush3.bf16.msra.mxu0 (!%p314_p10), %v843_v9  ;;  %v849_v18 = vpack.c.bf16 (!%p314_p10), %v510_v16, %v509_v15  ;;  %v852_v20 = vpack.c.bf16 (!%p314_p10), %v512_v19, %v511_v17  ;;  %v513_v21 = vld [vmem:[%s1293_s5 + $0x20] sm:$0xff] (!%p314_p10)  ;;  %v514_v22 = vld [vmem:[%s1293_s5 + $0x28] sm:$0xff] (!%p314_p10)  ;;  %v515_v24 = vld [vmem:[%s1293_s5 + $0x30] sm:$0xff] (!%p314_p10)  ;;  %931 = vset.pattern.permute.xlu1 (!%p314_p10), %v1018_v49 }
  0x12   : > { %845 = vmatprep.subr.bf16.mxu0 (!%p314_p10), %v1015_v10  ;;  %v855_v23 = vpack.c.bf16 (!%p314_p10), %v514_v22, %v513_v21  ;;  %v516_v25 = vld [vmem:[%s1293_s5 + $0x38] sm:$0xff] (!%p314_p10)  ;;  %v517_v27 = vld [vmem:[%s1293_s5 + $0x40] sm:$0xff] (!%p314_p10)  ;;  %v518_v28 = vld [vmem:[%s1293_s5 + $0x48] sm:$0xff] (!%p314_p10)  ;;  %932 = vset.pattern.permute.xlu0 (!%p314_p10), %v1018_v49 }
  0x13   : > { %850 = vmatpush3.bf16.msra.mxu1 (!%p314_p10), %v849_v18  ;;  %v858_v26 = vpack.c.bf16 (!%p314_p10), %v516_v25, %v515_v24  ;;  %v861_v29 = vpack.c.bf16 (!%p314_p10), %v518_v28, %v517_v27  ;;  %v519_v30 = vld [vmem:[%s1293_s5 + $0x50] sm:$0xff] (!%p314_p10)  ;;  %v520_v31 = vld [vmem:[%s1293_s5 + $0x58] sm:$0xff] (!%p314_p10)  ;;  %v521_v33 = vld [vmem:[%s1293_s5 + $0x60] sm:$0xff] (!%p314_p10) }
  0x14   : > { %851 = vmatprep.subr.bf16.mxu1 (!%p314_p10), %v1015_v10  ;;  %v864_v32 = vpack.c.bf16 (!%p314_p10), %v520_v31, %v519_v30  ;;  %v522_v34 = vld [vmem:[%s1293_s5 + $0x68] sm:$0xff] (!%p314_p10)  ;;  %v765_v40 = vld [vmem:[%s1289_s1] ss:$0 sm:$0xff] (!%p314_p10)  ;;  %v523_v46 = vld [vmem:[%s1293_s5 + $0x70] sm:$0xff] (!%p314_p10) }
  0x15   : > { %847 = vmatpush3.bf16.msra.mxu0 (!%p314_p10), %v846_v13  ;;  %v867_v35 = vpack.c.bf16 (!%p314_p10), %v522_v34, %v521_v33  ;;  %v766_v42 = vld [vmem:[%s1290_s2] ss:$0 sm:$0xff] (!%p314_p10)  ;;  %v524_v47 = vld [vmem:[%s1293_s5 + $0x78] sm:$0xff] (!%p314_p10) }
  0x16   : > { %s1122_s19 = scalar_select %p362_p11, %s1005_s30, 1  ;;  %v870_v48 = vpack.c.bf16 %v524_v47, %v523_v46  ;;  %v767_v51 = vld [vmem:[%s1292_s4] ss:$0 sm:$0xff] }
  0x17   : > { %853 = vmatpush3.bf16.msra.mxu1 %v852_v20  ;;  %v769_v60 = vld [vmem:[%s1294_s6] ss:$0 sm:$0xff]  ;;  %s1019_s30 = smov [#allocation3]  }
  0x18   : > { %s1298_s20 = sshll.u32 %s1122_s19, 3  ;;  %854 = vmatprep.subr.bf16.mxu1 %v1015_v10  ;;  %s939_s26 = sshll.u32 %s1019_s30, 4  ;;  %s940_s26 = int_to_ptr.vmem [resolvable:$false] %s939_s26 }
  0x19   : > { %s365_s23 = scalar_lea.vmem %s1288_s0, %s1298_s20  ;;  %s1301_s20 = sshll.u32 %s1122_s19, 3 }
  0x1a   : > { %v1130_v0 = vld [vmem:[%s365_s23] sm:$0xff]  ;;  %s762_s23 = sshll.u32 %s1297_s22, 3  ;;  %s1237_s22 = scalar_lea.hbm %s1296_s8, %s771_s12 }
  0x1b   : > { %v389_v1 = vsel %vm388_vm0, %v1130_v0, 0.0  ;;  %s1155_s24 = scalar_lea.vmem [#allocation3], %s762_s23  ;;  %856 = vmatpush3.bf16.msra.mxu1 %v855_v23  ;;  %s382_s23 = scalar_lea.vmem %s1295_s7, %s1301_s20 }
  0x1c   : > { %390 = vadd.xlane.f32.xlu0 %v389_v1  ;;  %420 = vst.msk [vmem:[%s1155_s24] sm:$0xff] %vm388_vm0, %v1017_v14  ;;  %857 = vmatprep.subr.bf16.mxu1 %v1015_v10  ;;  %v609_v50 = vld [vmem:[%s382_s23] sm:$0xff]  ;;  %s633_s14 = sshll.u32 %s1155_s24, 4  ;;  %s620_s23 = scalar_lea.sflag [#allocation4], %s1302_s21  ;;  %s1239_s14 = int_to_ptr.vmem [resolvable:$true] %s633_s14 }
  0x1d   : > { %612 = vperm.xlu1 %931, %v609_v50   ;;  %s935_s25 = scalar_lea.vmem %s1239_s14, 128  ;;  %s941_s19 = scalar_lea.vmem %s940_s26, 256 }
  0x1e   : > { %p936_p12 = scmp.ne.s32.totalorder %s1239_s14, %s935_s25  ;;  %p942_p1 = scmp.lt.s32.totalorder %s1239_s14, %s940_s26 }
  0x1f   : > { %859 = vmatpush3.bf16.msra.mxu1 %v858_v26  ;;  %p943_p2 = scmp.lt.s32.totalorder %s941_s19, %s935_s25 }
  0x20   : > { %860 = vmatprep.subr.bf16.mxu1 %v1015_v10  ;;  %p937_p13 = pnand %p936_p12, %p1105_p4 }
  0x21   : > { %p944_p3 = por %p943_p2, %p942_p1 }
  0x22   : > { %p938_p0 = pneg %p937_p13 }
  0x23   : > { %862 = vmatpush3.bf16.msra.mxu1 %v861_v29  ;;  %v508_v56 = vld [vmem:[%s1155_s24] sm:$0xff] }
  0x24   : > { %863 = vmatprep.subr.bf16.mxu1 %v1015_v10  ;;  %p945_p5 = pnand %p944_p3, %p938_p0 }
  0x27   : > { %865 = vmatpush3.bf16.msra.mxu1 %v864_v32 }
  0x28   : > { %866 = vmatprep.subr.bf16.mxu1 %v1015_v10 }
  0x2b   : > { %868 = vmatpush3.bf16.msra.mxu1 %v867_v35 }
  0x2c   : > { %869 = vmatprep.subr.bf16.mxu1 %v1015_v10 }
  0x2f   : > { %871 = vmatpush3.bf16.msra.mxu1 %v870_v48 }
  0x9c   : > { %v613_v61 = vpop.permute.xlu1 %612 }
  0xa9   : > { %v391_v2 = vpop.xlane.xlu0 %390 }
  0xaa   : > { %v393_v3 = vmul.f32 0.03125, %v391_v2 }
  0xac   : > { %v1135_v4 = vsub.f32 %v1130_v0, %v393_v3 }
  0xae   : > { %v395_v5 = vmul.f32 %v1135_v4, %v1135_v4 }
  0xb0   : > { %v396_v6 = vsel %vm388_vm0, %v395_v5, 0.0 }
  0xb1   : > { %397 = vadd.xlane.f32.xlu0 %v396_v6 }
 0x13e   : > { %v398_v36 = vpop.xlane.xlu0 %397 }
 0x13f   : > { %v399_v37 = vmul.f32 0.03125, %v398_v36 }
 0x141   : > { %v400_v38 = vadd.f32 1e-06, %v399_v37 }
 0x143   : > { %933 = vrsqrt.f32 %v400_v38 }
 0x14d   : > { %v934_v39 = vpop.eup %933 }
 0x14e   : > { %v402_v41 = vmul.f32 %v934_v39, %v1135_v4 }
 0x150   : > { %v410_v43 = vmul.f32 %v765_v40, %v402_v41 }
 0x152   : > { %v418_v44 = vadd.f32 %v766_v42, %v410_v43 }
 0x154   : > { %419 = vst.msk [vmem:[#allocation2] sm:$0xff] %vm388_vm0, %v418_v44 }
 0x15b   : > { %v421_v45 = vld [vmem:[#allocation2] sm:$0xff] }
 0x15c   : > { %805 = vmatmul.mubr.msk.f32.vlgmr.msra.gmra.mrb[0].mxu0 %vm388_vm0, %v421_v45 }
 0x22f   : > { %v503_v52 = vpop.f32.mrb[0].mxu0 }
 0x230   : > { %v504_v53 = vadd.f32 %v767_v51, %v503_v52  ;;  %v806_v54 = vpop.f32.mrb[1].mxu0 }
 0x232   : > { %v507_v55 = vmax.f32 %v504_v53, 0.0 }
 0x234   : > { %840 = vmatmul.mubr.f32.vlgmr.msra.gmra.mrb[0].mxu1 %v507_v55 }
 0x307   : > { %v591_v57 = vpop.f32.mrb[0].mxu1 }
 0x308   : > { %v595_v58 = vadd.f32 %v591_v57, %v508_v56  ;;  %v841_v59 = vpop.f32.mrb[1].mxu1 }
 0x30a   : > { %596 = vst.msk [vmem:[%s1155_s24] sm:$0xff] %vm388_vm0, %v595_v58 }
 0x311   : > { %v600_v62 = vld [vmem:[%s1155_s24] sm:$0xff] }
 0x312   : > { %v608_v63 = vadd.f32 %v769_v60, %v600_v62 }
 0x314   : > { %v615_v1 = vmul.f32 %v613_v61, %v608_v63 }
 0x316   : > { %v617_v2 = vadd.f32 %v615_v1, %v1130_v0 }
 0x318   : > { %618 = vst.msk [vmem:[%s1155_s24] sm:$0xff] %vm388_vm0, %v617_v2 }
 0x319   : > { %948 = shalt.err (!%p945_p5)
}
 0x31a   : > { %s949_s24 = scalar_lea.hbm %s1237_s22, 128  ;;  %s953_s16 = scalar_lea.hbm %s1296_s8, 256 }
 0x31b   : > { %p950_p6 = scmp.ne.s32.totalorder %s1237_s22, %s949_s24  ;;  %p954_p10 = scmp.lt.u32.totalorder %s1237_s22, %s1296_s8 }
 0x31c   : > { %p955_p11 = scmp.lt.u32.totalorder %s953_s16, %s949_s24  ;;  %p957_p13 = scmp.lt.u32.totalorder %s949_s24, %s1237_s22 }
 0x31d   : > { %p951_p7 = pnand %p950_p6, %p1105_p4 }
 0x31e   : > { %p956_p12 = por %p955_p11, %p954_p10 }
 0x31f   : > { %p952_p9 = pneg %p951_p7 }
 0x320   : > { %p958_p0 = por %p957_p13, %p956_p12 }
 0x322   : > { %p959_p1 = pnand %p958_p0, %p952_p9 }
 0x324   : > { %962 = shalt.err (!%p959_p1)
}
 0x325   : > { %872 = dma.vmem_to_hbm [thread:$0]  (%p1105_p4), %s1239_s14, 128, %s1237_s22, %s620_s23  }
 0x326 PF: > { %p878_p2 = scmp.ge.s32.totalorder %s1013_s10, 2  ;;  %s645_s25 = sand.u32 1, %s993_s27  }
 0x327   : > { %s646_s30 = scalar_lea.sflag [#allocation4], %s645_s25 }
 0x328   : > { %p875_p3 = pnand %p878_p2, %p1112_p8 }
 0x32a   : > { %988 = dma.done.wait (!%p875_p3), %s646_s30, 128  }
 0x32b   : > { %990 = vsyncadd (!%p875_p3), %s646_s30, 4294967168  ;;  %s21_s10 = sadd.s32 1, %s1013_s10   ;;  %s1303_s27 = smov %s997_s28 }
 0x32c   : > { %p18_p5 = scmp.ge.s32.totalorder %s21_s10, 4   ;;  %s1304_s28 = smov %s1001_s29 }
 0x32d   : > { %s1305_s29 = smov %s1118_s18  ;;  %s1306_s30 = smov %s1009_s9 }
 0x32e   : > { %s1307_s9 = smov %s1309_s13  ;;  %20 = sbr.rel (!%p18_p5) target bundleno = 4 (0x4), region = 107 }
 0x335   :  { %651 = vsyncpa [#allocation4], 1 }
 0x336   :  { %653 = vsyncpa [#allocation4 + $0x1], 1 }

</bundles_post_ra>
